<compile_context>
chip_gen: v6e
topology: v6e:2x2x1
jax: 0.10.0
libtpu: 0.0.40
codegen_flags: <defaults>
</compile_context>

<pallas_src>
import jax
import jax.numpy as jnp
from jax.experimental import pallas as pl
from jax.experimental.pallas import tpu as pltpu

_LANES = 128
_NEG_BIG = -1e30  # effectively -inf for padded classes; exp() underflows to 0.


def nossl_kernel(x_ref, w_ref, b_ref, maxp_ref, pred_ref):
    """Linear logits -> (max softmax prob, argmax) per row."""
    # x arrives f32 (single HBM pass); cast to bf16 on the VPU just before the
    # MXU.  The cast is hidden under the dominant x DMA.
    x = x_ref[...].astype(jnp.bfloat16)       # [TB, D]
    w = w_ref[...]                             # [D, Fp] bf16 (padded cols are 0)
    b = b_ref[...]                             # [1, Fp] f32  (padded cols -1e30)

    # model(inputs): linear classifier on the MXU, f32 accumulate.
    logits = jnp.dot(x, w, preferred_element_type=jnp.float32) + b   # [TB, Fp]

    # Row max (padded lanes can never win because of the -1e30 bias).
    row_max = jnp.max(logits, axis=1, keepdims=True)                 # [TB, 1]

    # softmax denominator with the same shift the reference uses.  Since the
    # shifted row max is exactly 0, max(probs) == 1 / denom.  Exact reciprocal.
    e = jnp.exp(logits - row_max)                                    # padded -> 0
    denom = jnp.sum(e, axis=1, keepdims=True)                        # [TB, 1]
    maxp_ref[...] = 1.0 / denom

    # argmax(probs) == argmax(logits); first index on ties (torch semantics).
    f_pad = logits.shape[1]
    lane_idx = jax.lax.broadcasted_iota(jnp.int32, logits.shape, 1)  # [TB, Fp]
    cand = jnp.where(logits == row_max, lane_idx, jnp.int32(f_pad))
    pred_ref[...] = jnp.min(cand, axis=1, keepdims=True)             # [TB, 1] i32


def _round_up(x, m):
    return ((x + m - 1) // m) * m


def _choose_batch_tile(batch, d, fp):
    """Rows per grid step, sized against a conservative per-TC VMEM budget."""
    budget = 24 * 1024 * 1024                    # headroom under 32 MiB scoped / 64 MiB v7x
    fixed = 2 * d * fp * 2 + 2 * 2 * fp * 4      # W (bf16, 2 pipeline bufs) + b (f32, 2 bufs)
    per_row = 2 * d * 4 + 5 * fp * 4             # f32 x double-buffer + ~5 f32 [TB,Fp] temps
    rows = max(8, (budget - fixed) // per_row)
    tb = max(8, min(2048, (rows // 8) * 8))
    # Keep >= 2 grid steps when possible so the "parallel" axis shards across
    # both v7x TensorCores (no effect on single-TC v5e/v6e).
    half = _round_up(max(1, -(-batch // 2)), 8)
    return max(8, min(tb, half))


def nossl_forward(params, edge_matrix, inputs_nchw, labels, coarse_tp=0, fine_tp=1):
    """NoSSL.forward(model, inputs, labels) -> (ssl_stats, 0.0).

    params: (W [D, F], b [F]) of the linear "model"
    edge_matrix: [F, C_coarse] with exactly one 1.0 per row
    inputs_nchw: [B, C, H, W] float32
    labels: [coarse_labels [B], fine_labels [B]]  (coarse_tp=0, fine_tp=1)
    """
    W, b = params
    B = inputs_nchw.shape[0]
    D = W.shape[0]
    F = W.shape[1]

    # ---- wrapper-side layout prep (free glue, no extra passes over x) ------
    x = inputs_nchw.reshape(B, D)                # metadata-only; stays f32

    # Pad the class axis lane-dense: 128 for small classifiers, 256 past 128
    # classes so the RHS fills the 256-wide v6e/v7x MXU.
    mult = _LANES if F <= _LANES else 2 * _LANES
    Fp = _round_up(F, mult)
    w_bf = jnp.zeros((D, Fp), jnp.bfloat16).at[:, :F].set(W.astype(jnp.bfloat16))
    b_p = jnp.full((1, Fp), jnp.float32(_NEG_BIG)).at[0, :F].set(
        b.reshape(-1).astype(jnp.float32))

    TB = _choose_batch_tile(B, D, Fp)
    n_tiles = pl.cdiv(B, TB)   # ragged last tile: unspecified rows in, OOB writes dropped

    max_probs, pred = pl.pallas_call(
        nossl_kernel,
        grid=(n_tiles,),
        out_shape=(
            jax.ShapeDtypeStruct((B, 1), jnp.float32),   # max_probs
            jax.ShapeDtypeStruct((B, 1), jnp.int32),     # pred (fine class)
        ),
        in_specs=[
            pl.BlockSpec((TB, D), lambda i: (i, 0)),     # x tile (f32, pipelined)
            pl.BlockSpec((D, Fp), lambda i: (0, 0)),     # W (bf16, grid-invariant)
            pl.BlockSpec((1, Fp), lambda i: (0, 0)),     # b  (padded -1e30)
        ],
        out_specs=(
            pl.BlockSpec((TB, 1), lambda i: (i, 0)),
            pl.BlockSpec((TB, 1), lambda i: (i, 0)),
        ),
        compiler_params=pltpu.CompilerParams(
            dimension_semantics=("parallel",),
            vmem_limit_bytes=32 * 1024 * 1024,
        ),
    )(x, w_bf, b_p)

    max_probs = max_probs[:, 0]
    pred = pred[:, 0]

    # ---- calc_ssl_stats bookkeeping (host/XLA glue, no kernel needed) ------
    fine_to_coarse = jnp.argmax(edge_matrix, axis=1).astype(jnp.int32)   # [F]
    pred_coarse = jnp.take(fine_to_coarse, pred)                         # [B]

    pred_labels = jnp.stack(
        [pred_coarse.astype(jnp.float32), pred.astype(jnp.float32)], axis=0)      # [2, N]
    gt_labels = jnp.stack(
        [labels[coarse_tp].astype(jnp.float32), labels[fine_tp].astype(jnp.float32)],
        axis=0)                                                                    # [2, N]
    ssl_stats = {
        "max_probs": max_probs[None, :],     # [1, N]
        "pred_labels": pred_labels,          # [2, N]
        "gt_labels": gt_labels,              # [2, N]
    }
    return ssl_stats, 0.0


if __name__ == "__main__":
    key = jax.random.PRNGKey(0)

    # small, NCHW-consistent shapes
    B, C, H, Wsp = 8, 4, 16, 16
    D = C * H * Wsp                 # 1024
    NUM_FINE = 8
    NUM_COARSE = 4

    k_x, k_w, k_b, k_lc, k_lf = jax.random.split(key, 5)
    inputs = jax.random.normal(k_x, (B, C, H, Wsp), dtype=jnp.float32)

    # deterministic "model" parameters (simple linear classifier D -> NUM_FINE)
    W = jax.random.normal(k_w, (D, NUM_FINE), dtype=jnp.float32) * 0.02
    b = jax.random.normal(k_b, (NUM_FINE,), dtype=jnp.float32) * 0.1

    # edge_matrix [NUM_FINE, NUM_COARSE]: fine class i -> coarse class i // 2
    edge_matrix = jnp.zeros((NUM_FINE, NUM_COARSE), dtype=jnp.float32)
    edge_matrix = edge_matrix.at[jnp.arange(NUM_FINE), jnp.arange(NUM_FINE) // 2].set(1.0)

    # labels = [coarse_labels, fine_labels]
    coarse_labels = jax.random.randint(k_lc, (B,), 0, NUM_COARSE, dtype=jnp.int32)
    fine_labels = jax.random.randint(k_lf, (B,), 0, NUM_FINE, dtype=jnp.int32)
    labels = [coarse_labels, fine_labels]

    ssl_stats, loss = nossl_forward((W, b), edge_matrix, inputs, labels)
    jax.block_until_ready(ssl_stats)

    # correctness check against a pure-JAX reference using the same bf16 matmul
    # precision the kernel uses (the "model" is mixed-precision by design; bf16
    # vs f32 argmax flips on near-ties are an acknowledged, accepted delta).
    x2d = inputs.reshape(B, D)
    ref_logits = jnp.dot(x2d.astype(jnp.bfloat16), W.astype(jnp.bfloat16),
                         preferred_element_type=jnp.float32) + b
    ref_logits = ref_logits - ref_logits.max(axis=1, keepdims=True)
    ref_probs = jax.nn.softmax(ref_logits, axis=1)
    ref_max = ref_probs.max(axis=1)
    ref_pred = jnp.argmax(ref_probs, axis=1)
    ref_f2c = jnp.argmax(edge_matrix, axis=1)[ref_pred]

    assert jnp.allclose(ssl_stats["max_probs"][0], ref_max, atol=1e-4, rtol=1e-4)
    assert jnp.all(ssl_stats["pred_labels"][1].astype(jnp.int32) == ref_pred)
    assert jnp.all(ssl_stats["pred_labels"][0].astype(jnp.int32) == ref_f2c)
    assert jnp.all(ssl_stats["gt_labels"][0] == coarse_labels.astype(jnp.float32))
    assert jnp.all(ssl_stats["gt_labels"][1] == fine_labels.astype(jnp.float32))
    assert loss == 0.0

    print("KERNEL_OK")
</pallas_src>

<mosaic_0001>
module attributes {stable_mosaic.version = 11 : i64} {
  func.func @nossl_kernel(%arg0: i32, %arg1: memref<8x1024xf32, #tpu.memory_space<vmem>>, %arg2: memref<1024x128xbf16, #tpu.memory_space<vmem>>, %arg3: memref<1x128xf32, #tpu.memory_space<vmem>>, %arg4: memref<8x1xf32, #tpu.memory_space<vmem>>, %arg5: memref<8x1xi32, #tpu.memory_space<vmem>>) attributes {dimension_semantics = [#tpu.dimension_semantics<parallel>], iteration_bounds = array<i64: 1>, scalar_prefetch = 0 : i64, scratch_operands = 0 : i64, tpu.core_type = #tpu.core_type<tc>, window_params = [{transform_indices = @transform_0, window_bounds = array<i64: 8, 1024>}, {pipeline_mode = #tpu.pipeline_mode<synchronous>, transform_indices = @transform_1, window_bounds = array<i64: 1024, 128>}, {pipeline_mode = #tpu.pipeline_mode<synchronous>, transform_indices = @transform_2, window_bounds = array<i64: 1, 128>}, {transform_indices = @transform_3, window_bounds = array<i64: 8, 1>}, {transform_indices = @transform_4, window_bounds = array<i64: 8, 1>}]} {
    %c0 = arith.constant 0 : index
    %c0_0 = arith.constant 0 : index
    %0 = vector.load %arg1[%c0, %c0_0] : memref<8x1024xf32, #tpu.memory_space<vmem>>, vector<8x1024xf32>
    %1 = arith.truncf %0 : vector<8x1024xf32> to vector<8x1024xbf16>
    %c0_1 = arith.constant 0 : index
    %c0_2 = arith.constant 0 : index
    %2 = vector.load %arg2[%c0_1, %c0_2] : memref<1024x128xbf16, #tpu.memory_space<vmem>>, vector<1024x128xbf16>
    %c0_3 = arith.constant 0 : index
    %c0_4 = arith.constant 0 : index
    %3 = vector.load %arg3[%c0_3, %c0_4] : memref<1x128xf32, #tpu.memory_space<vmem>>, vector<1x128xf32>
    %cst = arith.constant dense<0.000000e+00> : vector<8x128xf32>
    %4 = tpu.matmul %1, %2, %cst {dimension_numbers = #tpu.dot_dimension_numbers<[1], [0], [0], [1], [0, 0, 1, 1], [], []>} : vector<8x1024xbf16>, vector<1024x128xbf16>, vector<8x128xf32> -> vector<8x128xf32>
    %5 = vector.broadcast %3 : vector<1x128xf32> to vector<8x128xf32>
    %6 = arith.addf %4, %5 : vector<8x128xf32>
    %cst_5 = arith.constant dense<0xFF800000> : vector<8xf32>
    %7 = vector.multi_reduction <maximumf>, %6, %cst_5 [1] : vector<8x128xf32> to vector<8xf32>
    %8 = vector.shape_cast %7 : vector<8xf32> to vector<8x1xf32>
    %9 = vector.broadcast %8 : vector<8x1xf32> to vector<8x128xf32>
    %10 = arith.subf %6, %9 : vector<8x128xf32>
    %11 = math.exp %10 : vector<8x128xf32>
    %cst_6 = arith.constant dense<0.000000e+00> : vector<8xf32>
    %12 = vector.multi_reduction <add>, %11, %cst_6 [1] : vector<8x128xf32> to vector<8xf32>
    %13 = vector.shape_cast %12 : vector<8xf32> to vector<8x1xf32>
    %cst_7 = arith.constant 1.000000e+00 : f32
    %14 = vector.broadcast %cst_7 : f32 to vector<8x1xf32>
    %15 = arith.divf %14, %13 : vector<8x1xf32>
    %c0_8 = arith.constant 0 : index
    %c0_9 = arith.constant 0 : index
    %16 = vector.load %arg4[%c0_8, %c0_9] : memref<8x1xf32, #tpu.memory_space<vmem>>, vector<8x1xf32>
    tpu.vector_store %arg4[%c0_8, %c0_9], %15 {strides = array<i32>} : memref<8x1xf32, #tpu.memory_space<vmem>>, vector<8x1xf32>,
    %17 = tpu.iota {dimensions = array<i32: 1>} : vector<8x128xi32>
    %18 = vector.broadcast %8 : vector<8x1xf32> to vector<8x128xf32>
    %19 = arith.cmpf oeq, %6, %18 : vector<8x128xf32>
    %c128_i32 = arith.constant 128 : i32
    %20 = vector.broadcast %c128_i32 : i32 to vector<8x128xi32>
    %21 = arith.select %19, %17, %20 : vector<8x128xi1>, vector<8x128xi32>
    %cst_10 = arith.constant dense<2147483647> : vector<8xi32>
    %22 = vector.multi_reduction <minsi>, %21, %cst_10 [1] : vector<8x128xi32> to vector<8xi32>
    %23 = vector.shape_cast %22 : vector<8xi32> to vector<8x1xi32>
    %c0_11 = arith.constant 0 : index
    %c0_12 = arith.constant 0 : index
    %24 = vector.load %arg5[%c0_11, %c0_12] : memref<8x1xi32, #tpu.memory_space<vmem>>, vector<8x1xi32>
    tpu.vector_store %arg5[%c0_11, %c0_12], %23 {strides = array<i32>} : memref<8x1xi32, #tpu.memory_space<vmem>>, vector<8x1xi32>,
    return
  }
  func.func @transform_0(%arg0: i32) -> (i32, i32) {
    %c0_i32 = arith.constant 0 : i32
    %c0_i32_0 = arith.constant 0 : i32
    return %arg0, %c0_i32 : i32, i32
  }
  func.func @transform_1(%arg0: i32) -> (i32, i32) {
    %c0_i32 = arith.constant 0 : i32
    %c0_i32_0 = arith.constant 0 : i32
    %c0_i32_1 = arith.constant 0 : i32
    return %c0_i32, %c0_i32_0 : i32, i32
  }
  func.func @transform_2(%arg0: i32) -> (i32, i32) {
    %c0_i32 = arith.constant 0 : i32
    %c0_i32_0 = arith.constant 0 : i32
    %c0_i32_1 = arith.constant 0 : i32
    return %c0_i32, %c0_i32_0 : i32, i32
  }
  func.func @transform_3(%arg0: i32) -> (i32, i32) {
    %c0_i32 = arith.constant 0 : i32
    %c0_i32_0 = arith.constant 0 : i32
    return %arg0, %c0_i32 : i32, i32
  }
  func.func @transform_4(%arg0: i32) -> (i32, i32) {
    %c0_i32 = arith.constant 0 : i32
    %c0_i32_0 = arith.constant 0 : i32
    return %arg0, %c0_i32 : i32, i32
  }
}

</mosaic_0001>

<bundles_post_ra>
// kernel: tpu_custom_call.1
= control target key start
LH: loop header
LB: loop body
LE: loop exit
PB: predicated region body
PF: predicated region fallthrough
CT: control target
= control target key end

     0   :  { %10 = vsyncpa [#allocation3], 0  ;;  %s1091_s0 = inlined_call_operand.hbm [shape: f32[8,1024], index: 0, kind: input, shape index: {}]   ;;  %s1092_s1 = inlined_call_operand.hbm [shape: bf16[1024,128], index: 1, kind: input, shape index: {}]   ;;  %s1093_s2 = inlined_call_operand.vmem [shape: f32[1,128], index: 2, kind: input, shape index: {}]   ;;  %s1094_s3 = inlined_call_operand.vmem [shape: f32[8,1], index: 3, kind: output, shape index: {0}]   ;;  %s1095_s4 = inlined_call_operand.vmem [shape: s32[8,1], index: 4, kind: output, shape index: {1}]  }
   0x1   :  { %11 = vsyncpa [#allocation5], 0  ;;  %s1047_s15 = smov [#allocation2]   ;;  %s1048_s17 = smov [#allocation4]  }
   0x2   :  { %s18_s16 = sshll.u32 %s1047_s15, 4  ;;  %s27_s18 = sshll.u32 %s1048_s17, 4  ;;  %s19_s16 = int_to_ptr.vmem [resolvable:$true] %s18_s16  ;;  %s28_s18 = int_to_ptr.vmem [resolvable:$true] %s27_s18 }
   0x3   :  { %s1011_s19 = scalar_lea.vmem %s19_s16, 1024  ;;  %p1016_p1 = scmp.lt.s32.totalorder %s19_s16, %s19_s16 }
   0x4   :  { %p1012_p0 = scmp.ne.s32.totalorder %s19_s16, %s1011_s19  ;;  %p1017_p2 = scmp.lt.s32.totalorder %s1011_s19, %s1011_s19 }
   0x6   :  { %p1018_p3 = por %p1017_p2, %p1016_p1 }
   0x8   :  { %p1019_p4 = pnand %p1018_p3, %p1012_p0 }
   0xa   :  { %1022 = shalt.err (!%p1019_p4)
}
   0xb   :  { %21 = dma.hbm_to_vmem [thread:$0]  %s1091_s0, 1024, %s19_s16, [#allocation3]  }
   0xc   :  { %s1031_s22 = scalar_lea.vmem %s28_s18, 8192  ;;  %p1036_p6 = scmp.lt.s32.totalorder %s28_s18, %s28_s18 }
   0xd   :  { %p1032_p5 = scmp.ne.s32.totalorder %s28_s18, %s1031_s22  ;;  %p1037_p7 = scmp.lt.s32.totalorder %s1031_s22, %s1031_s22 }
   0xf   :  { %p1038_p8 = por %p1037_p7, %p1036_p6 }
  0x11   :  { %p1039_p9 = pnand %p1038_p8, %p1032_p5 }
  0x13   :  { %1042 = shalt.err (!%p1039_p9)
}
  0x14   :  { %s1049_s23 = smov 64   ;;  %s1050_s24 = smov 4  }
  0x15   :  { %33 = dma.hbm_to_vmem [thread:$0]  %s1092_s1, 8192, %s28_s18, [#allocation5], %s1049_s23, %s1049_s23, %s1050_s24  }
  0x16   :  { %1043 = dma.done.wait [#allocation3], 1024  }
  0x17   :  { %1044 = vsyncadd [#allocation3], 4294966272 }
  0x18   :  { %1045 = dma.done.wait [#allocation5], 8192  }
  0x19   :  { %1046 = vsyncadd [#allocation5], 4294959104  ;;  %v935_v0 = vld [vmem:[#allocation4 + $0x78] sm:$0xff]   ;;  %v939_v4 = vld [vmem:[#allocation4 + $0x70] sm:$0xff]   ;;  %vm747_vm2 = vcmask 7168  }
  0x1a   :  { %v936_v1 = vld [vmem:[#allocation4 + $0xf8] sm:$0xff]   ;;  %843 = vmatprep.subr.bf16.mxu0 %v935_v0  ;;  %v940_v5 = vld [vmem:[#allocation4 + $0xf0] sm:$0xff]   ;;  %v943_v8 = vld [vmem:[#allocation4 + $0x68] sm:$0xff]  }
  0x1b   :  { %v937_v2 = vld [vmem:[#allocation4 + $0x38] sm:$0xff]   ;;  %865 = vmatprep.subr.bf16.mxu1 %v936_v1  ;;  %v941_v6 = vld [vmem:[#allocation4 + $0x30] sm:$0xff]   ;;  %v944_v9 = vld [vmem:[#allocation4 + $0xe8] sm:$0xff]  }
  0x1c   :  { %v938_v3 = vld [vmem:[#allocation4 + $0xb8] sm:$0xff]   ;;  %844 = vmatpush3.bf16.msra.mxu0 %v937_v2  ;;  %v942_v7 = vld [vmem:[#allocation4 + $0xb0] sm:$0xff]   ;;  %v945_v10 = vld [vmem:[#allocation4 + $0x28] sm:$0xff]  }
  0x1d   :  { %866 = vmatpush3.bf16.msra.mxu1 %v938_v3  ;;  %845 = vmatprep.subr.bf16.mxu0 %v939_v4  ;;  %v946_v11 = vld [vmem:[#allocation4 + $0xa8] sm:$0xff]   ;;  %v947_v12 = vld [vmem:[#allocation4 + $0x60] sm:$0xff]   ;;  %v951_v16 = vld [vmem:[#allocation4 + $0x58] sm:$0xff]  }
  0x1e   :  { %867 = vmatprep.subr.bf16.mxu1 %v940_v5  ;;  %v948_v13 = vld [vmem:[#allocation4 + $0xe0] sm:$0xff]   ;;  %v952_v17 = vld [vmem:[#allocation4 + $0xd8] sm:$0xff]   ;;  %v955_v20 = vld [vmem:[#allocation4 + $0x50] sm:$0xff]  }
  0x1f   :  { %v949_v14 = vld [vmem:[#allocation4 + $0x20] sm:$0xff]   ;;  %v953_v18 = vld [vmem:[#allocation4 + $0x18] sm:$0xff]   ;;  %v956_v21 = vld [vmem:[#allocation4 + $0xd0] sm:$0xff]  }
  0x20   :  { %846 = vmatpush3.bf16.msra.mxu0 %v941_v6  ;;  %v950_v15 = vld [vmem:[#allocation4 + $0xa0] sm:$0xff]   ;;  %v954_v19 = vld [vmem:[#allocation4 + $0x98] sm:$0xff]   ;;  %v957_v22 = vld [vmem:[#allocation4 + $0x10] sm:$0xff]  }
  0x21   :  { %868 = vmatpush3.bf16.msra.mxu1 %v942_v7  ;;  %847 = vmatprep.subr.bf16.mxu0 %v943_v8  ;;  %v958_v23 = vld [vmem:[#allocation4 + $0x90] sm:$0xff]   ;;  %v959_v24 = vld [vmem:[#allocation4 + $0x48] sm:$0xff]   ;;  %v963_v28 = vld [vmem:[#allocation4 + $0x40] sm:$0xff]  }
  0x22   :  { %869 = vmatprep.subr.bf16.mxu1 %v944_v9  ;;  %v960_v25 = vld [vmem:[#allocation4 + $0xc8] sm:$0xff]   ;;  %v964_v29 = vld [vmem:[#allocation4 + $0xc0] sm:$0xff]   ;;  %v46_v33 = vld [vmem:[#allocation2 + $0x18] sm:$0xff] }
  0x23   :  { %v961_v26 = vld [vmem:[#allocation4 + $0x8] sm:$0xff]   ;;  %v965_v30 = vld [vmem:[#allocation4] sm:$0xff]   ;;  %v54_v36 = vpack.c.bf16 %v46_v33, %v46_v33  ;;  %v45_v38 = vld [vmem:[#allocation2 + $0x10] sm:$0xff] }
  0x24   :  { %848 = vmatpush3.bf16.msra.mxu0 %v945_v10  ;;  %v962_v27 = vld [vmem:[#allocation4 + $0x88] sm:$0xff]   ;;  %v966_v31 = vld [vmem:[#allocation4 + $0x80] sm:$0xff]   ;;  %v53_v39 = vpack.c.bf16 %v45_v38, %v45_v38  ;;  %v967_v40 = vld [vmem:[#allocation4 + $0x178] sm:$0xff]  }
  0x25   :  { %870 = vmatpush3.bf16.msra.mxu1 %v946_v11  ;;  %849 = vmatprep.subr.bf16.mxu0 %v947_v12  ;;  %v44_v32 = vld [vmem:[#allocation2 + $0x8] sm:$0xff]  ;;  %v43_v34 = vld [vmem:[#allocation2] sm:$0xff]  ;;  %v968_v41 = vld [vmem:[#allocation4 + $0x1f8] sm:$0xff]  }
  0x26   :  { %871 = vmatprep.subr.bf16.mxu1 %v948_v13  ;;  %v52_v35 = vpack.c.bf16 %v44_v32, %v44_v32  ;;  %v51_v37 = vpack.c.bf16 %v43_v34, %v43_v34  ;;  %650 = vmatprep.mubr.bf16.mxu1 %v54_v36  ;;  %v969_v42 = vld [vmem:[#allocation4 + $0x138] sm:$0xff]   ;;  %v971_v44 = vld [vmem:[#allocation4 + $0x170] sm:$0xff]   ;;  %v975_v48 = vld [vmem:[#allocation4 + $0x168] sm:$0xff]  }
  0x27   :  { %v970_v43 = vld [vmem:[#allocation4 + $0x1b8] sm:$0xff]   ;;  %v972_v45 = vld [vmem:[#allocation4 + $0x1f0] sm:$0xff]   ;;  %v976_v49 = vld [vmem:[#allocation4 + $0x1e8] sm:$0xff]  }
  0x28   :  { %850 = vmatpush3.bf16.msra.mxu0 %v949_v14  ;;  %610 = vmatprep.mubr.bf16.mxu0 %v52_v35  ;;  %v973_v46 = vld [vmem:[#allocation4 + $0x130] sm:$0xff]   ;;  %v977_v50 = vld [vmem:[#allocation4 + $0x128] sm:$0xff]   ;;  %v979_v52 = vld [vmem:[#allocation4 + $0x160] sm:$0xff]  }
  0x29   :  { %872 = vmatpush3.bf16.msra.mxu1 %v950_v15  ;;  %851 = vmatprep.subr.bf16.mxu0 %v951_v16  ;;  %v974_v47 = vld [vmem:[#allocation4 + $0x1b0] sm:$0xff]   ;;  %v978_v51 = vld [vmem:[#allocation4 + $0x1a8] sm:$0xff]   ;;  %v980_v53 = vld [vmem:[#allocation4 + $0x1e0] sm:$0xff]  }
  0x2a   :  { %873 = vmatprep.subr.bf16.mxu1 %v952_v17  ;;  %v981_v54 = vld [vmem:[#allocation4 + $0x120] sm:$0xff]   ;;  %v983_v56 = vld [vmem:[#allocation4 + $0x158] sm:$0xff]   ;;  %v987_v60 = vld [vmem:[#allocation4 + $0x150] sm:$0xff]  }
  0x2b   :  { %v982_v55 = vld [vmem:[#allocation4 + $0x1a0] sm:$0xff]   ;;  %v984_v57 = vld [vmem:[#allocation4 + $0x1d8] sm:$0xff]   ;;  %v988_v61 = vld [vmem:[#allocation4 + $0x1d0] sm:$0xff]  }
  0x2c   :  { %852 = vmatpush3.bf16.msra.mxu0 %v953_v18  ;;  %v985_v58 = vld [vmem:[#allocation4 + $0x118] sm:$0xff]   ;;  %v989_v62 = vld [vmem:[#allocation4 + $0x110] sm:$0xff]   ;;  %v991_v0 = vld [vmem:[#allocation4 + $0x148] sm:$0xff]  }
  0x2d   :  { %874 = vmatpush3.bf16.msra.mxu1 %v954_v19  ;;  %853 = vmatprep.subr.bf16.mxu0 %v955_v20  ;;  %v986_v59 = vld [vmem:[#allocation4 + $0x198] sm:$0xff]   ;;  %v990_v63 = vld [vmem:[#allocation4 + $0x190] sm:$0xff]   ;;  %v992_v1 = vld [vmem:[#allocation4 + $0x1c8] sm:$0xff]  }
  0x2e   :  { %875 = vmatprep.subr.bf16.mxu1 %v956_v21  ;;  %v993_v2 = vld [vmem:[#allocation4 + $0x108] sm:$0xff]   ;;  %v995_v4 = vld [vmem:[#allocation4 + $0x140] sm:$0xff]   ;;  %v50_v9 = vld [vmem:[#allocation2 + $0x38] sm:$0xff] }
  0x2f   :  { %v994_v3 = vld [vmem:[#allocation4 + $0x188] sm:$0xff]   ;;  %v996_v5 = vld [vmem:[#allocation4 + $0x1c0] sm:$0xff]   ;;  %v58_v11 = vpack.c.bf16 %v50_v9, %v50_v9  ;;  %v49_v13 = vld [vmem:[#allocation2 + $0x30] sm:$0xff] }
  0x30   :  { %854 = vmatpush3.bf16.msra.mxu0 %v957_v22  ;;  %v997_v6 = vld [vmem:[#allocation4 + $0x100] sm:$0xff]   ;;  %v48_v8 = vld [vmem:[#allocation2 + $0x28] sm:$0xff]  ;;  %v57_v15 = vpack.c.bf16 %v49_v13, %v49_v13 }
  0x31   :  { %876 = vmatpush3.bf16.msra.mxu1 %v958_v23  ;;  %855 = vmatprep.subr.bf16.mxu0 %v959_v24  ;;  %v998_v7 = vld [vmem:[#allocation4 + $0x180] sm:$0xff]   ;;  %v56_v10 = vpack.c.bf16 %v48_v8, %v48_v8 }
  0x32   :  { %877 = vmatprep.subr.bf16.mxu1 %v960_v25  ;;  %v47_v12 = vld [vmem:[#allocation2 + $0x20] sm:$0xff] }
  0x33   :  { %v55_v14 = vpack.c.bf16 %v47_v12, %v47_v12  ;;  %v778_v25 = vld [vmem:[%s1093_s2] ss:$0 sm:$0xff] }
  0x34   :  { %856 = vmatpush3.bf16.msra.mxu0 %v961_v26 }
  0x35   :  { %878 = vmatpush3.bf16.msra.mxu1 %v962_v27  ;;  %857 = vmatprep.subr.bf16.mxu0 %v963_v28 }
  0x36   :  { %879 = vmatprep.subr.bf16.mxu1 %v964_v29 }
  0x38   :  { %858 = vmatpush3.bf16.msra.mxu0 %v965_v30 }
  0x39   :  { %880 = vmatpush3.bf16.msra.mxu1 %v966_v31  ;;  %887 = vmatprep.subr.bf16.mxu0 %v967_v40 }
  0x3a   :  { %909 = vmatprep.subr.bf16.mxu1 %v968_v41  ;;  %v749_v41 = vlaneseq }
  0x3b   :  { %611 = vmatmul.mubr.bf16.vlgmr.msra.gmra.mxu0 %v51_v37 }
  0x3c   :  { %651 = vmatmul.mubr.bf16.vlgmr.msra.gmra.mxu1 %v53_v39  ;;  %888 = vmatpush3.bf16.msra.mxu0 %v969_v42  ;;  %v750_v42 = vand.u32 127, %v749_v41 }
  0x3d   :  { %910 = vmatpush3.bf16.msra.mxu1 %v970_v43  ;;  %889 = vmatprep.subr.bf16.mxu0 %v971_v44 }
  0x3e   :  { %911 = vmatprep.subr.bf16.mxu1 %v972_v45  ;;  %690 = vmatprep.mubr.bf16.mxu0 %v56_v10 }
  0x3f   :  { %730 = vmatprep.mubr.bf16.mxu1 %v58_v11 }
  0x40   :  { %890 = vmatpush3.bf16.msra.mxu0 %v973_v46 }
  0x41   :  { %912 = vmatpush3.bf16.msra.mxu1 %v974_v47  ;;  %891 = vmatprep.subr.bf16.mxu0 %v975_v48 }
  0x42   :  { %913 = vmatprep.subr.bf16.mxu1 %v976_v49 }
  0x44   :  { %892 = vmatpush3.bf16.msra.mxu0 %v977_v50 }
  0x45   :  { %914 = vmatpush3.bf16.msra.mxu1 %v978_v51  ;;  %893 = vmatprep.subr.bf16.mxu0 %v979_v52 }
  0x46   :  { %915 = vmatprep.subr.bf16.mxu1 %v980_v53 }
  0x48   :  { %894 = vmatpush3.bf16.msra.mxu0 %v981_v54 }
  0x49   :  { %916 = vmatpush3.bf16.msra.mxu1 %v982_v55  ;;  %895 = vmatprep.subr.bf16.mxu0 %v983_v56 }
  0x4a   :  { %917 = vmatprep.subr.bf16.mxu1 %v984_v57 }
  0x4c   :  { %896 = vmatpush3.bf16.msra.mxu0 %v985_v58 }
  0x4d   :  { %918 = vmatpush3.bf16.msra.mxu1 %v986_v59  ;;  %897 = vmatprep.subr.bf16.mxu0 %v987_v60 }
  0x4e   :  { %919 = vmatprep.subr.bf16.mxu1 %v988_v61 }
  0x50   :  { %898 = vmatpush3.bf16.msra.mxu0 %v989_v62 }
  0x51   :  { %920 = vmatpush3.bf16.msra.mxu1 %v990_v63  ;;  %899 = vmatprep.subr.bf16.mxu0 %v991_v0 }
  0x52   :  { %921 = vmatprep.subr.bf16.mxu1 %v992_v1 }
  0x54   :  { %900 = vmatpush3.bf16.msra.mxu0 %v993_v2 }
  0x55   :  { %922 = vmatpush3.bf16.msra.mxu1 %v994_v3  ;;  %901 = vmatprep.subr.bf16.mxu0 %v995_v4 }
  0x56   :  { %923 = vmatprep.subr.bf16.mxu1 %v996_v5 }
  0x58   :  { %902 = vmatpush3.bf16.msra.mxu0 %v997_v6 }
  0x59   :  { %924 = vmatpush3.bf16.msra.mxu1 %v998_v7 }
  0x5b   :  { %691 = vmatmul.mubr.bf16.vlgmr.msra.gmra.mxu0 %v55_v14 }
  0x5c   :  { %731 = vmatmul.mubr.bf16.vlgmr.msra.gmra.mxu1 %v57_v15 }
  0xfb   :  { %v859_v16 = vpop.f32.mrf.mxu0 }
  0xfc   :  { %v881_v17 = vpop.f32.mrf.mxu1 }
  0xfd   :  { %v860_v18 = vpop.f32.mrf.mxu0 }
  0xfe   :  { %v882_v19 = vpop.f32.mrf.mxu1  ;;  %v861_v24 = vadd.f32 %v860_v18, %v859_v16 }
  0xff   :  { %v862_v20 = vpop.f32.mrf.mxu0  ;;  %v883_v27 = vadd.f32 %v882_v19, %v881_v17 }
 0x100   :  { %v884_v21 = vpop.f32.mrf.mxu1  ;;  %v613_v26 = vadd.f32 %v861_v24, %v778_v25 }
 0x101   :  { %v863_v22 = vpop.f32.mrf.mxu0 }
 0x102   :  { %v885_v23 = vpop.f32.mrf.mxu1  ;;  %v653_v31 = vadd.f32 %v883_v27, %v613_v26 }
 0x11b   :  { %v903_v28 = vpop.f32.mrf.mxu0 }
 0x11c   :  { %v925_v29 = vpop.f32.mrf.mxu1 }
 0x11d   :  { %v904_v30 = vpop.f32.mrf.mxu0 }
 0x11e   :  { %v905_v32 = vadd.f32 %v904_v30, %v903_v28  ;;  %v926_v33 = vpop.f32.mrf.mxu1 }
 0x11f   :  { %v906_v34 = vpop.f32.mrf.mxu0  ;;  %v927_v36 = vadd.f32 %v926_v33, %v925_v29 }
 0x120   :  { %v693_v35 = vadd.f32 %v905_v32, %v653_v31  ;;  %v928_v37 = vpop.f32.mrf.mxu1 }
 0x121   :  { %v907_v38 = vpop.f32.mrf.mxu0 }
 0x122   :  { %v733_v39 = vadd.f32 %v927_v36, %v693_v35  ;;  %v929_v40 = vpop.f32.mrf.mxu1 }
 0x124   :  { %738 = vmax.xlane.f32.xlu0 %v733_v39 }
 0x1ad   :  { %v739_v43 = vpop.xlane.xlu0 %738 }
 0x1ae   :  { %v740_v44 = vsub.f32 %v733_v39, %v739_v43  ;;  %vm751_vm0 = vcmp.eq.f32.partialorder %v733_v39, %v739_v43 }
 0x1af   :  { %v752_v45 = vsel %vm751_vm0, %v750_v42, 128 }
 0x1b0   :  { %v741_v46 = vmul.f32 1.442695, %v740_v44  ;;  %v754_v47 = vshra.s32 %v752_v45, 16  ;;  %v753_v50 = vand.u32 65535, %v752_v45 }
 0x1b2   :  { %999 = vpow2.f32 %v741_v46  ;;  %v756_v48 = vcvt.s32.f32 %v754_v47  ;;  %v755_v52 = vcvt.s32.f32 %v753_v50 }
 0x1b4   :  { %757 = vmin.xlane.f32.xlu0 %v756_v48 }
 0x1bf   :  { %v1000_v49 = vpop.eup %999 }
 0x1c0   :  { %743 = vadd.xlane.f32.xlu1 %v1000_v49 }
 0x23d   :  { %v758_v51 = vpop.xlane.xlu0 %757 }
 0x23e   :  { %vm759_vm1 = vcmp.eq.f32.partialorder %v756_v48, %v758_v51  ;;  %v764_v56 = vcvt.f32.s32 %v758_v51 }
 0x23f   :  { %v760_v53 = vsel %vm759_vm1, %v755_v52, inf }
 0x240   :  { %761 = vmin.xlane.f32.xlu1 %v760_v53  ;;  %v765_v58 = vshll.u32 %v764_v56, 16 }
 0x249   :  { %v744_v54 = vpop.xlane.xlu1 %743 }
 0x24a   :  { %1001 = vrcp.f32 %v744_v54 }
 0x257   :  { %v1002_v55 = vpop.eup %1001 }
 0x258   :  { %748 = vst.msk [vmem:[%s1094_s3] sm:$0xff] %vm747_vm2, %v1002_v55 }
 0x2c9   :  { %v762_v57 = vpop.xlane.xlu1 %761 }
 0x2ca   :  { %v763_v59 = vcvt.f32.s32 %v762_v57 }
 0x2cc   :  { %v766_v60 = vadd.s32 %v765_v58, %v763_v59 }
 0x2ce   :  { %767 = vst.msk [vmem:[%s1095_s4] sm:$0xff] %vm747_vm2, %v766_v60 }
 0x2cf   :  { %776 = vsyncpa [#allocation3], 1 }
 0x2d0   :  { %777 = vsyncpa [#allocation5], 1 }

</bundles_post_ra>
